<compile_context>
chip_gen: v7x
topology: tpu7x:2x2x1
jax: 0.10.0
libtpu: 0.0.40
codegen_flags: <defaults>
</compile_context>

<pallas_src>
import functools

import jax
import jax.numpy as jnp
from jax.experimental import pallas as pl
from jax.experimental.pallas import tpu as pltpu

LEAKY_SLOPE = 0.2
LN_EPS = 1e-5

# Fully-resident weights must fit comfortably in v7x's 64 MiB VMEM per TC.
_WEIGHT_VMEM_BUDGET = 48 * 1024 * 1024


def _leaky_relu(v):
    # max(v, 0.2*v): valid for slope < 1, 2 VALU ops instead of 3.
    return jnp.maximum(v, LEAKY_SLOPE * v)


def _round_up(a, m):
    return (a + m - 1) // m * m


def _choose_bm(n, block_m):
    # Aim for >= 2 row blocks so v7x's second TensorCore gets work via the
    # "parallel" grid axis; rows rounded to 16 for bf16 sublane packing.
    if n <= 16:
        return 16
    if n <= 2 * block_m:
        return min(block_m, _round_up(-(-n // 2), 16))
    return block_m


def _make_mlp_kernel(n_parts):
    """One row-block: fused (concat) + Linear + LeakyReLU + Linear + LayerNorm
    + LeakyReLU + Linear.  First n_parts refs are input parts, next n_parts
    the matching row-slices of W1, then b1, w2, b2, g2, be2, w3, b3, out."""

    def kernel(*refs):
        x_refs = refs[:n_parts]
        w1_refs = refs[n_parts:2 * n_parts]
        (b1_ref, w2_ref, b2_ref, g2_ref, be2_ref,
         w3_ref, b3_ref, o_ref) = refs[2 * n_parts:]

        # ---- Layer 1: (fused concat) Linear(in, H0) + LeakyReLU ----------
        acc = jnp.dot(x_refs[0][...], w1_refs[0][...],
                      preferred_element_type=jnp.float32)
        for xr, wr in zip(x_refs[1:], w1_refs[1:]):
            acc = acc + jnp.dot(xr[...], wr[...],
                                preferred_element_type=jnp.float32)
        h = _leaky_relu(acc + b1_ref[...])                       # f32

        # ---- Layer 2: Linear(H0, H1) + LayerNorm(H1) + LeakyReLU ---------
        h = jnp.dot(h.astype(jnp.bfloat16), w2_ref[...],
                    preferred_element_type=jnp.float32) + b2_ref[...]
        inv_h1 = jnp.float32(1.0 / h.shape[-1])
        mean = jnp.sum(h, axis=-1, keepdims=True) * inv_h1
        centered = h - mean
        var = jnp.sum(centered * centered, axis=-1, keepdims=True) * inv_h1
        h = centered * jax.lax.rsqrt(var + LN_EPS)
        h = _leaky_relu(h * g2_ref[...] + be2_ref[...])

        # ---- Output layer: Linear(H1, d_out_padded), no last_activation --
        out = jnp.dot(h.astype(jnp.bfloat16), w3_ref[...],
                      preferred_element_type=jnp.float32) + b3_ref[...]
        o_ref[...] = out.astype(o_ref.dtype)

    return kernel


def make_mlp_forward(params, part_dims, *, block_m=256, out_dtype=jnp.float32):
    """Pre-convert weights once and return a jitted forward(*x_parts)."""
    w1, b1, w2, b2, g2, be2, w3, b3 = params
    part_dims = tuple(int(d) for d in part_dims)
    h0, h1 = int(w1.shape[1]), int(w2.shape[1])
    d_out = int(w3.shape[1])
    d_out_p = _round_up(d_out, 128)            # lane-dense output slab
    out_itemsize = jnp.dtype(out_dtype).itemsize

    # Narrow input parts: concat in the wrapper + one layer-1 dot (tiny-K MXU
    # pushes are nearly all padding); wide parts keep the fused per-part dot
    # so the concatenated x never hits HBM.
    merge_parts = len(part_dims) > 1 and max(part_dims) < 128
    if merge_parts or len(part_dims) == 1:
        kernel_dims = (sum(part_dims),)
        w1_bf = (w1.astype(jnp.bfloat16),)
    else:
        kernel_dims = part_dims
        offs = [0]
        for d in part_dims:
            offs.append(offs[-1] + d)
        w1_bf = tuple(w1[offs[i]:offs[i + 1], :].astype(jnp.bfloat16)
                      for i in range(len(part_dims)))

    # One-time bf16 cast / lane padding (reused across calls).
    w2_bf = w2.astype(jnp.bfloat16)
    w3_p = jnp.pad(w3, ((0, 0), (0, d_out_p - d_out))).astype(jnp.bfloat16)
    b3_p = jnp.pad(b3, ((0, 0), (0, d_out_p - d_out))).astype(jnp.float32)
    b1_f = b1.astype(jnp.float32)
    b2_f = b2.astype(jnp.float32)
    g2_f = g2.astype(jnp.float32)
    be2_f = be2.astype(jnp.float32)

    sum_d = sum(kernel_dims)
    weight_bytes = (2 * (sum_d * h0 + h0 * h1 + h1 * d_out_p)   # bf16 matrices
                    + 4 * (h0 + 3 * h1 + d_out_p))              # f32 bias/LN vectors
    # TODO(synk): add a K/N-tiled streaming path (extra grid axis or
    # pltpu.emit_pipeline) when hidden dims are too large for resident weights.
    assert weight_bytes <= _WEIGHT_VMEM_BUDGET, (
        "weights too large for the fully-resident VMEM strategy")

    kernel = _make_mlp_kernel(len(kernel_dims))

    @jax.jit
    def forward(*x_parts):
        assert tuple(xp.shape[1] for xp in x_parts) == part_dims
        n = x_parts[0].shape[0]
        if len(kernel_dims) == 1 and len(x_parts) > 1:
            x_in = (jnp.concatenate(x_parts, axis=1).astype(jnp.bfloat16),)
        else:
            x_in = tuple(xp.astype(jnp.bfloat16) for xp in x_parts)

        bm = _choose_bm(n, block_m)
        grid = (pl.cdiv(n, bm),)
        rows = lambda i: (i, 0)      # row-blocked activations / output
        full = lambda i: (0, 0)      # weights: constant block index
        resident = pl.Buffered(1)    # single-buffer the resident weights

        in_specs = (
            [pl.BlockSpec((bm, d), rows) for d in kernel_dims]
            + [pl.BlockSpec(w.shape, full, pipeline_mode=resident)
               for w in w1_bf]
            + [
                pl.BlockSpec((1, h0), full, pipeline_mode=resident),        # b1
                pl.BlockSpec((h0, h1), full, pipeline_mode=resident),       # w2
                pl.BlockSpec((1, h1), full, pipeline_mode=resident),        # b2
                pl.BlockSpec((1, h1), full, pipeline_mode=resident),        # ln gamma
                pl.BlockSpec((1, h1), full, pipeline_mode=resident),        # ln beta
                pl.BlockSpec((h1, d_out_p), full, pipeline_mode=resident),  # w3
                pl.BlockSpec((1, d_out_p), full, pipeline_mode=resident),   # b3
            ]
        )

        # VMEM footprint: single-buffered weights + double-buffered input /
        # output row blocks + f32 intermediates + slack.
        act_bytes = bm * (h0 + h1 + d_out_p) * 4
        io_bytes = 2 * bm * sum_d * 2 + 2 * bm * d_out_p * out_itemsize
        vmem_needed = weight_bytes + io_bytes + act_bytes + (4 << 20)
        vmem_limit = int(min(max(vmem_needed, 32 << 20), 100 << 20))

        flops = 2 * n * (sum_d * h0 + h0 * h1 + h1 * d_out_p) \
            + 10 * n * (h0 + 2 * h1)
        bytes_accessed = (n * sum_d * 2 + weight_bytes
                          + n * d_out_p * out_itemsize)
        cost = pl.CostEstimate(flops=int(flops), transcendentals=0,
                               bytes_accessed=int(bytes_accessed))

        out_p = pl.pallas_call(
            kernel,
            out_shape=jax.ShapeDtypeStruct((n, d_out_p), out_dtype),
            grid_spec=pltpu.PrefetchScalarGridSpec(
                num_scalar_prefetch=0,
                grid=grid,
                in_specs=in_specs,
                out_specs=pl.BlockSpec((bm, d_out_p), rows),
            ),
            compiler_params=pltpu.CompilerParams(
                dimension_semantics=("parallel",),
                vmem_limit_bytes=vmem_limit,
            ),
            cost_estimate=cost,
        )(*x_in, *w1_bf, b1_f, w2_bf, b2_f, g2_f, be2_f, w3_p, b3_p)

        # Lane-padded slab -> true output width (skipped when already dense).
        return out_p if d_out == d_out_p else out_p[:, :d_out]

    return forward


def init_params(key, input_dim, hidden_dims, output_dim, dtype=jnp.float32):
    """Deterministic synthetic init (shapes match torch.nn.Linear / LayerNorm)."""
    h0, h1 = hidden_dims
    ks = jax.random.split(key, 6)
    w1 = jax.random.normal(ks[0], (input_dim, h0), dtype) * 0.1
    b1 = jax.random.normal(ks[1], (1, h0), dtype) * 0.1
    w2 = jax.random.normal(ks[2], (h0, h1), dtype) * 0.1
    b2 = jax.random.normal(ks[3], (1, h1), dtype) * 0.1
    g2 = jnp.ones((1, h1), dtype)    # LayerNorm weight
    be2 = jnp.zeros((1, h1), dtype)  # LayerNorm bias
    w3 = jax.random.normal(ks[4], (h1, output_dim), dtype) * 0.1
    b3 = jax.random.normal(ks[5], (1, output_dim), dtype) * 0.1
    return (w1, b1, w2, b2, g2, be2, w3, b3)


def reference_forward(x_parts, params):
    """Pure-JAX reference mirroring the PyTorch module, with the same bf16
    matmul / f32 accumulation dtype policy as the kernel."""
    w1, b1, w2, b2, g2, be2, w3, b3 = params
    x = jnp.concatenate(x_parts, axis=1).astype(jnp.bfloat16)
    h = jnp.dot(x, w1.astype(jnp.bfloat16),
                preferred_element_type=jnp.float32) + b1
    h = _leaky_relu(h)
    h = jnp.dot(h.astype(jnp.bfloat16), w2.astype(jnp.bfloat16),
                preferred_element_type=jnp.float32) + b2
    mean = jnp.mean(h, axis=-1, keepdims=True)
    var = jnp.mean((h - mean) ** 2, axis=-1, keepdims=True)
    h = (h - mean) * jax.lax.rsqrt(var + LN_EPS) * g2 + be2
    h = _leaky_relu(h)
    return jnp.dot(h.astype(jnp.bfloat16), w3.astype(jnp.bfloat16),
                   preferred_element_type=jnp.float32) + b3


if __name__ == "__main__":
    key = jax.random.PRNGKey(0)
    k_x, k_extra, k_p = jax.random.split(key, 3)

    # forward(x, *args) concatenates along dim=1; parts are passed separately
    # and handled inside make_mlp_forward (merged here since they are narrow).
    batch, base_dim, extra_dim = 8, 12, 4
    input_dim = base_dim + extra_dim          # 16
    hidden_dims = [32, 64]
    output_dim = 8

    x_base = jax.random.normal(k_x, (batch, base_dim), jnp.float32)
    x_extra = jax.random.normal(k_extra, (batch, extra_dim), jnp.float32)
    x_parts = (x_base, x_extra)

    params = init_params(k_p, input_dim, hidden_dims, output_dim)
    forward = make_mlp_forward(params, (base_dim, extra_dim))

    out = jax.block_until_ready(forward(*x_parts))

    ref = reference_forward(x_parts, params)
    assert out.shape == (batch, output_dim)
    assert jnp.allclose(out, ref, atol=2e-3, rtol=2e-3), "mismatch vs reference"

    print("KERNEL_OK")
</pallas_src>

<mosaic_0001>
module attributes {stable_mosaic.version = 11 : i64} {
  func.func @kernel(%arg0: i32, %arg1: memref<16x16xbf16, #tpu.memory_space<vmem>>, %arg2: memref<16x32xbf16, #tpu.memory_space<vmem>>, %arg3: memref<1x32xf32, #tpu.memory_space<vmem>>, %arg4: memref<32x64xbf16, #tpu.memory_space<vmem>>, %arg5: memref<1x64xf32, #tpu.memory_space<vmem>>, %arg6: memref<1x64xf32, #tpu.memory_space<vmem>>, %arg7: memref<1x64xf32, #tpu.memory_space<vmem>>, %arg8: memref<64x128xbf16, #tpu.memory_space<vmem>>, %arg9: memref<1x128xf32, #tpu.memory_space<vmem>>, %arg10: memref<16x128xf32, #tpu.memory_space<vmem>>) attributes {dimension_semantics = [#tpu.dimension_semantics<parallel>], iteration_bounds = array<i64: 1>, scalar_prefetch = 0 : i64, scratch_operands = 0 : i64, tpu.core_type = #tpu.core_type<tc>, window_params = [{transform_indices = @transform_0, window_bounds = array<i64: 16, 16>}, {pipeline_mode = #tpu.pipeline_mode<synchronous>, transform_indices = @transform_1, window_bounds = array<i64: 16, 32>}, {pipeline_mode = #tpu.pipeline_mode<synchronous>, transform_indices = @transform_2, window_bounds = array<i64: 1, 32>}, {pipeline_mode = #tpu.pipeline_mode<synchronous>, transform_indices = @transform_3, window_bounds = array<i64: 32, 64>}, {pipeline_mode = #tpu.pipeline_mode<synchronous>, transform_indices = @transform_4, window_bounds = array<i64: 1, 64>}, {pipeline_mode = #tpu.pipeline_mode<synchronous>, transform_indices = @transform_5, window_bounds = array<i64: 1, 64>}, {pipeline_mode = #tpu.pipeline_mode<synchronous>, transform_indices = @transform_6, window_bounds = array<i64: 1, 64>}, {pipeline_mode = #tpu.pipeline_mode<synchronous>, transform_indices = @transform_7, window_bounds = array<i64: 64, 128>}, {pipeline_mode = #tpu.pipeline_mode<synchronous>, transform_indices = @transform_8, window_bounds = array<i64: 1, 128>}, {transform_indices = @transform_9, window_bounds = array<i64: 16, 128>}]} {
    %c0 = arith.constant 0 : index
    %c0_0 = arith.constant 0 : index
    %0 = vector.load %arg1[%c0, %c0_0] : memref<16x16xbf16, #tpu.memory_space<vmem>>, vector<16x16xbf16>
    %c0_1 = arith.constant 0 : index
    %c0_2 = arith.constant 0 : index
    %1 = vector.load %arg2[%c0_1, %c0_2] : memref<16x32xbf16, #tpu.memory_space<vmem>>, vector<16x32xbf16>
    %cst = arith.constant dense<0.000000e+00> : vector<16x32xf32>
    %2 = tpu.matmul %0, %1, %cst {dimension_numbers = #tpu.dot_dimension_numbers<[1], [0], [0], [1], [0, 0, 1, 1], [], []>} : vector<16x16xbf16>, vector<16x32xbf16>, vector<16x32xf32> -> vector<16x32xf32>
    %c0_3 = arith.constant 0 : index
    %c0_4 = arith.constant 0 : index
    %3 = vector.load %arg3[%c0_3, %c0_4] : memref<1x32xf32, #tpu.memory_space<vmem>>, vector<1x32xf32>
    %4 = vector.broadcast %3 : vector<1x32xf32> to vector<16x32xf32>
    %5 = arith.addf %2, %4 : vector<16x32xf32>
    %cst_5 = arith.constant 2.000000e-01 : f32
    %6 = vector.broadcast %cst_5 : f32 to vector<16x32xf32>
    %7 = arith.mulf %6, %5 : vector<16x32xf32>
    %8 = arith.maximumf %5, %7 : vector<16x32xf32>
    %9 = arith.truncf %8 : vector<16x32xf32> to vector<16x32xbf16>
    %c0_6 = arith.constant 0 : index
    %c0_7 = arith.constant 0 : index
    %10 = vector.load %arg4[%c0_6, %c0_7] : memref<32x64xbf16, #tpu.memory_space<vmem>>, vector<32x64xbf16>
    %cst_8 = arith.constant dense<0.000000e+00> : vector<16x64xf32>
    %11 = tpu.matmul %9, %10, %cst_8 {dimension_numbers = #tpu.dot_dimension_numbers<[1], [0], [0], [1], [0, 0, 1, 1], [], []>} : vector<16x32xbf16>, vector<32x64xbf16>, vector<16x64xf32> -> vector<16x64xf32>
    %c0_9 = arith.constant 0 : index
    %c0_10 = arith.constant 0 : index
    %12 = vector.load %arg5[%c0_9, %c0_10] : memref<1x64xf32, #tpu.memory_space<vmem>>, vector<1x64xf32>
    %13 = vector.broadcast %12 : vector<1x64xf32> to vector<16x64xf32>
    %14 = arith.addf %11, %13 : vector<16x64xf32>
    %cst_11 = arith.constant dense<0.000000e+00> : vector<16xf32>
    %15 = vector.multi_reduction <add>, %14, %cst_11 [1] : vector<16x64xf32> to vector<16xf32>
    %16 = vector.shape_cast %15 : vector<16xf32> to vector<16x1xf32>
    %cst_12 = arith.constant 1.562500e-02 : f32
    %17 = vector.broadcast %cst_12 : f32 to vector<16x1xf32>
    %18 = arith.mulf %16, %17 : vector<16x1xf32>
    %19 = vector.broadcast %18 : vector<16x1xf32> to vector<16x64xf32>
    %20 = arith.subf %14, %19 : vector<16x64xf32>
    %21 = arith.mulf %20, %20 : vector<16x64xf32>
    %cst_13 = arith.constant dense<0.000000e+00> : vector<16xf32>
    %22 = vector.multi_reduction <add>, %21, %cst_13 [1] : vector<16x64xf32> to vector<16xf32>
    %23 = vector.shape_cast %22 : vector<16xf32> to vector<16x1xf32>
    %cst_14 = arith.constant 1.562500e-02 : f32
    %24 = vector.broadcast %cst_14 : f32 to vector<16x1xf32>
    %25 = arith.mulf %23, %24 : vector<16x1xf32>
    %cst_15 = arith.constant 9.99999974E-6 : f32
    %26 = vector.broadcast %cst_15 : f32 to vector<16x1xf32>
    %27 = arith.addf %25, %26 : vector<16x1xf32>
    %28 = math.rsqrt %27 : vector<16x1xf32>
    %29 = vector.broadcast %28 : vector<16x1xf32> to vector<16x64xf32>
    %30 = arith.mulf %20, %29 : vector<16x64xf32>
    %c0_16 = arith.constant 0 : index
    %c0_17 = arith.constant 0 : index
    %31 = vector.load %arg6[%c0_16, %c0_17] : memref<1x64xf32, #tpu.memory_space<vmem>>, vector<1x64xf32>
    %32 = vector.broadcast %31 : vector<1x64xf32> to vector<16x64xf32>
    %33 = arith.mulf %30, %32 : vector<16x64xf32>
    %c0_18 = arith.constant 0 : index
    %c0_19 = arith.constant 0 : index
    %34 = vector.load %arg7[%c0_18, %c0_19] : memref<1x64xf32, #tpu.memory_space<vmem>>, vector<1x64xf32>
    %35 = vector.broadcast %34 : vector<1x64xf32> to vector<16x64xf32>
    %36 = arith.addf %33, %35 : vector<16x64xf32>
    %cst_20 = arith.constant 2.000000e-01 : f32
    %37 = vector.broadcast %cst_20 : f32 to vector<16x64xf32>
    %38 = arith.mulf %37, %36 : vector<16x64xf32>
    %39 = arith.maximumf %36, %38 : vector<16x64xf32>
    %40 = arith.truncf %39 : vector<16x64xf32> to vector<16x64xbf16>
    %c0_21 = arith.constant 0 : index
    %c0_22 = arith.constant 0 : index
    %41 = vector.load %arg8[%c0_21, %c0_22] : memref<64x128xbf16, #tpu.memory_space<vmem>>, vector<64x128xbf16>
    %cst_23 = arith.constant dense<0.000000e+00> : vector<16x128xf32>
    %42 = tpu.matmul %40, %41, %cst_23 {dimension_numbers = #tpu.dot_dimension_numbers<[1], [0], [0], [1], [0, 0, 1, 1], [], []>} : vector<16x64xbf16>, vector<64x128xbf16>, vector<16x128xf32> -> vector<16x128xf32>
    %c0_24 = arith.constant 0 : index
    %c0_25 = arith.constant 0 : index
    %43 = vector.load %arg9[%c0_24, %c0_25] : memref<1x128xf32, #tpu.memory_space<vmem>>, vector<1x128xf32>
    %44 = vector.broadcast %43 : vector<1x128xf32> to vector<16x128xf32>
    %45 = arith.addf %42, %44 : vector<16x128xf32>
    %c0_26 = arith.constant 0 : index
    %c0_27 = arith.constant 0 : index
    %46 = vector.load %arg10[%c0_26, %c0_27] : memref<16x128xf32, #tpu.memory_space<vmem>>, vector<16x128xf32>
    tpu.vector_store %arg10[%c0_26, %c0_27], %45 {strides = array<i32>} : memref<16x128xf32, #tpu.memory_space<vmem>>, vector<16x128xf32>,
    return
  }
  func.func @transform_0(%arg0: i32) -> (i32, i32) {
    %c0_i32 = arith.constant 0 : i32
    %c0_i32_0 = arith.constant 0 : i32
    return %arg0, %c0_i32 : i32, i32
  }
  func.func @transform_1(%arg0: i32) -> (i32, i32) {
    %c0_i32 = arith.constant 0 : i32
    %c0_i32_0 = arith.constant 0 : i32
    %c0_i32_1 = arith.constant 0 : i32
    return %c0_i32, %c0_i32_0 : i32, i32
  }
  func.func @transform_2(%arg0: i32) -> (i32, i32) {
    %c0_i32 = arith.constant 0 : i32
    %c0_i32_0 = arith.constant 0 : i32
    %c0_i32_1 = arith.constant 0 : i32
    return %c0_i32, %c0_i32_0 : i32, i32
  }
  func.func @transform_3(%arg0: i32) -> (i32, i32) {
    %c0_i32 = arith.constant 0 : i32
    %c0_i32_0 = arith.constant 0 : i32
    %c0_i32_1 = arith.constant 0 : i32
    return %c0_i32, %c0_i32_0 : i32, i32
  }
  func.func @transform_4(%arg0: i32) -> (i32, i32) {
    %c0_i32 = arith.constant 0 : i32
    %c0_i32_0 = arith.constant 0 : i32
    %c0_i32_1 = arith.constant 0 : i32
    return %c0_i32, %c0_i32_0 : i32, i32
  }
  func.func @transform_5(%arg0: i32) -> (i32, i32) {
    %c0_i32 = arith.constant 0 : i32
    %c0_i32_0 = arith.constant 0 : i32
    %c0_i32_1 = arith.constant 0 : i32
    return %c0_i32, %c0_i32_0 : i32, i32
  }
  func.func @transform_6(%arg0: i32) -> (i32, i32) {
    %c0_i32 = arith.constant 0 : i32
    %c0_i32_0 = arith.constant 0 : i32
    %c0_i32_1 = arith.constant 0 : i32
    return %c0_i32, %c0_i32_0 : i32, i32
  }
  func.func @transform_7(%arg0: i32) -> (i32, i32) {
    %c0_i32 = arith.constant 0 : i32
    %c0_i32_0 = arith.constant 0 : i32
    %c0_i32_1 = arith.constant 0 : i32
    return %c0_i32, %c0_i32_0 : i32, i32
  }
  func.func @transform_8(%arg0: i32) -> (i32, i32) {
    %c0_i32 = arith.constant 0 : i32
    %c0_i32_0 = arith.constant 0 : i32
    %c0_i32_1 = arith.constant 0 : i32
    return %c0_i32, %c0_i32_0 : i32, i32
  }
  func.func @transform_9(%arg0: i32) -> (i32, i32) {
    %c0_i32 = arith.constant 0 : i32
    %c0_i32_0 = arith.constant 0 : i32
    return %arg0, %c0_i32 : i32, i32
  }
}

</mosaic_0001>

<bundles_post_ra>
// kernel: forward.1
= control target key start
LH: loop header
LB: loop body
LE: loop exit
PB: predicated region body
PF: predicated region fallthrough
CT: control target
= control target key end

     0   :  { %14 = vsyncpa [#allocation3], 0  ;;  %v418_v1 = vmov 0.0   ;;  %vm419_vm0 = vmmov 0   ;;  %vm56_vm1 = vcmask 130048   ;;  %vm129_vm2 = vcmask 261120   ;;  %s539_s0 = inlined_call_operand.vmem [shape: bf16[8,16], index: 0, kind: input, shape index: {}]   ;;  %s540_s1 = inlined_call_operand.vmem [shape: bf16[16,32], index: 1, kind: input, shape index: {}]   ;;  %s541_s2 = inlined_call_operand.vmem [shape: f32[1,32], index: 2, kind: input, shape index: {}]   ;;  %s542_s3 = inlined_call_operand.vmem [shape: bf16[32,64], index: 3, kind: input, shape index: {}]   ;;  %s543_s4 = inlined_call_operand.vmem [shape: f32[1,64], index: 4, kind: input, shape index: {}]   ;;  %s544_s5 = inlined_call_operand.vmem [shape: f32[1,64], index: 5, kind: input, shape index: {}]   ;;  %s545_s6 = inlined_call_operand.vmem [shape: f32[1,64], index: 6, kind: input, shape index: {}]   ;;  %s546_s7 = inlined_call_operand.vmem [shape: bf16[64,128], index: 7, kind: input, shape index: {}]   ;;  %s547_s8 = inlined_call_operand.vmem [shape: f32[1,128], index: 8, kind: input, shape index: {}]   ;;  %s548_s9 = inlined_call_operand.hbm [shape: f32[8,128], index: 9, kind: output, shape index: {}]  }
   0x1   :  { %v382_v0 = vld [vmem:[%s540_s1] sm:$0xff]   ;;  %351 = vmatprep.subr.bf16.mxu1 %v418_v1  ;;  %365 = vmatprep.subr.bf16.mxu0 %v418_v1  ;;  %v385_v4 = vld [vmem:[%s542_s3 + $0x8] sm:$0xff]   ;;  %vm174_vm3 = vcmask 523264   ;;  %v388_v38 = vld [vmem:[%s546_s7 + $0x10] sm:$0xff]  }
   0x2   :  { %v383_v2 = vld [vmem:[%s539_s0] sm:$0xff]   ;;  %352 = vmatpush3.bf16.msra.mxu1 %v382_v0  ;;  %353 = vmatprep.mubr.msk.bf16.mxu1 %vm419_vm0, %v418_v1  ;;  %v387_v37 = vld [vmem:[%s546_s7 + $0x8] sm:$0xff]   ;;  %v389_v39 = vld [vmem:[%s546_s7 + $0x18] sm:$0xff]  }
   0x3   :  { %357 = vmatprep.subr.bf16.mxu1 %v418_v1  ;;  %373 = vmatprep.mubr.msk.bf16.mxu0 %vm419_vm0, %v418_v1  ;;  %v384_v3 = vld [vmem:[%s542_s3] sm:$0xff]  }
   0x4   :  { %v325_v5 = vld [vmem:[%s541_s2] ss:$0 sm:$0xff] }
   0x5   :  { %354 = vmatmul.mubr.msk.bf16.vlgmr.msra.gmra.mrb[0].mxu1 %vm56_vm1, %v383_v2  ;;  %v329_v17 = vld [vmem:[%s543_s4] ss:$0 sm:$0xff] }
   0x6   :  { %361 = vmatprep.mubr.msk.bf16.mxu1 %vm419_vm0, %v418_v1  ;;  %358 = vmatpush3.bf16.msra.mxu1 %v384_v3  ;;  %v386_v36 = vld [vmem:[%s546_s7] sm:$0xff]  }
   0x7   :  { %359 = vmatprep.subr.bf16.mxu1 %v418_v1  ;;  %366 = vmatpush3.bf16.msra.mxu0 %v386_v36  ;;  %v333_v47 = vld [vmem:[%s544_s5] ss:$0 sm:$0xff] }
   0x8   :  { %367 = vmatprep.subr.bf16.mxu0 %v418_v1  ;;  %v334_v49 = vld [vmem:[%s545_s6] ss:$0 sm:$0xff] }
   0x9   :  { %v335_v61 = vld [vmem:[%s547_s8] ss:$0 sm:$0xff] }
   0xa   :  { %360 = vmatpush3.bf16.msra.mxu1 %v385_v4 }
   0xb   :  { %368 = vmatpush3.bf16.msra.mxu0 %v387_v37 }
   0xc   :  { %369 = vmatprep.subr.bf16.mxu0 %v418_v1 }
   0xf   :  { %370 = vmatpush3.bf16.msra.mxu0 %v388_v38 }
  0x10   :  { %371 = vmatprep.subr.bf16.mxu0 %v418_v1 }
  0x13   :  { %372 = vmatpush3.bf16.msra.mxu0 %v389_v39 }
  0xd8   :  { %v94_v6 = vpop.f32.mrb[0].mxu1 }
  0xd9   :  { %v95_v7 = vadd.f32 %v325_v5, %v94_v6  ;;  %v355_v8 = vpop.f32.mrb[1].mxu1 }
  0xda   :  { %v97_v9 = vpop.f32.mrb[2].mxu1 }
  0xdb   :  { %v101_v10 = vmul.f32 0.2, %v95_v7  ;;  %v98_v11 = vadd.f32 %v325_v5, %v97_v9  ;;  %v356_v12 = vpop.f32.mrb[3].mxu1 }
  0xdd   :  { %v102_v13 = vmul.f32 0.2, %v98_v11  ;;  %v103_v14 = vmax.f32 %v95_v7, %v101_v10 }
  0xdf   :  { %v104_v15 = vmax.f32 %v98_v11, %v102_v13 }
  0xe1   :  { %v105_v16 = vpack.c.bf16 %v104_v15, %v103_v14 }
  0xe3   :  { %362 = vmatmul.mubr.msk.bf16.vlgmr.msra.gmra.mrb[4].mxu1 %vm129_vm2, %v105_v16 }
 0x1b6   :  { %v167_v18 = vpop.f32.mrb[4].mxu1 }
 0x1b7   :  { %v168_v19 = vadd.f32 %v329_v17, %v167_v18  ;;  %v363_v20 = vpop.f32.mrb[5].mxu1 }
 0x1b8   :  { %v170_v21 = vpop.f32.mrb[6].mxu1 }
 0x1b9   :  { %v171_v22 = vadd.f32 %v329_v17, %v170_v21  ;;  %v364_v23 = vpop.f32.mrb[7].mxu1  ;;  %v175_v24 = vsel %vm174_vm3, %v168_v19, 0.0 }
 0x1ba   :  { %176 = vadd.xlane.f32.xlu0 %v175_v24 }
 0x1bb   :  { %v178_v25 = vsel %vm174_vm3, %v171_v22, 0.0 }
 0x1be   :  { %179 = vadd.xlane.f32.xlu0 %v178_v25 }
 0x247   :  { %v177_v26 = vpop.xlane.xlu0 %176 }
 0x248   :  { %v181_v27 = vmul.f32 0.015625, %v177_v26 }
 0x24a   :  { %v183_v28 = vsub.f32 %v168_v19, %v181_v27 }
 0x24b   :  { %v180_v29 = vpop.xlane.xlu0 %179 }
 0x24c   :  { %v182_v30 = vmul.f32 0.015625, %v180_v29  ;;  %v185_v31 = vmul.f32 %v183_v28, %v183_v28 }
 0x24e   :  { %v184_v32 = vsub.f32 %v171_v22, %v182_v30  ;;  %v187_v33 = vsel %vm174_vm3, %v185_v31, 0.0 }
 0x24f   :  { %188 = vadd.xlane.f32.xlu1 %v187_v33 }
 0x250   :  { %v186_v34 = vmul.f32 %v184_v32, %v184_v32 }
 0x252   :  { %v190_v35 = vsel %vm174_vm3, %v186_v34, 0.0 }
 0x253   :  { %191 = vadd.xlane.f32.xlu1 %v190_v35 }
 0x2dc   :  { %v189_v40 = vpop.xlane.xlu1 %188 }
 0x2dd   :  { %v193_v41 = vmul.f32 0.015625, %v189_v40 }
 0x2df   :  { %v195_v42 = vadd.f32 1e-05, %v193_v41 }
 0x2e0   :  { %v192_v43 = vpop.xlane.xlu1 %191 }
 0x2e1   :  { %390 = vrsqrt.f32 %v195_v42  ;;  %v194_v44 = vmul.f32 0.015625, %v192_v43 }
 0x2e3   :  { %v196_v45 = vadd.f32 1e-05, %v194_v44 }
 0x2e5   :  { %392 = vrsqrt.f32 %v196_v45 }
 0x2eb   :  { %v391_v46 = vpop.eup %390 }
 0x2ec   :  { %v199_v48 = vmul.f32 %v391_v46, %v183_v28 }
 0x2ee   :  { %v208_v50 = vmul.f32 %v333_v47, %v199_v48 }
 0x2ef   :  { %v393_v51 = vpop.eup %392 }
 0x2f0   :  { %v200_v52 = vmul.f32 %v393_v51, %v184_v32  ;;  %v217_v53 = vadd.f32 %v334_v49, %v208_v50 }
 0x2f2   :  { %v209_v54 = vmul.f32 %v333_v47, %v200_v52  ;;  %v219_v56 = vmul.f32 0.2, %v217_v53 }
 0x2f4   :  { %v218_v55 = vadd.f32 %v334_v49, %v209_v54  ;;  %v221_v58 = vmax.f32 %v217_v53, %v219_v56 }
 0x2f6   :  { %v220_v57 = vmul.f32 0.2, %v218_v55 }
 0x2f8   :  { %v222_v59 = vmax.f32 %v218_v55, %v220_v57 }
 0x2fa   :  { %v223_v60 = vpack.c.bf16 %v222_v59, %v221_v58 }
 0x2fc   :  { %374 = vmatmul.mubr.msk.bf16.vlgmr.msra.gmra.mrb[0].mxu0 %vm174_vm3, %v223_v60 }
 0x3cf   :  { %v300_v62 = vpop.f32.mrb[0].mxu0 }
 0x3d0   :  { %v301_v63 = vadd.f32 %v335_v61, %v300_v62  ;;  %v375_v0 = vpop.f32.mrb[1].mxu0 }
 0x3d1   :  { %v303_v1 = vpop.f32.mrb[2].mxu0 }
 0x3d2   :  { %307 = vst [vmem:[#allocation2] sm:$0xff] %v301_v63  ;;  %v304_v2 = vadd.f32 %v335_v61, %v303_v1  ;;  %v376_v3 = vpop.f32.mrb[3].mxu0 }
 0x3d4   :  { %308 = vst [vmem:[#allocation2 + $0x8] sm:$0xff] %v304_v2 }
 0x3d5   :  { %313 = vsyncadd [#allocation3], 128  ;;  %s420_s6 = smov [#allocation2]  }
 0x3d6   :  { %s314_s28 = sshll.u32 %s420_s6, 4  ;;  %s315_s28 = int_to_ptr.vmem [resolvable:$true] %s314_s28 }
 0x3d7   :  { %s394_s29 = scalar_lea.vmem %s315_s28, 128  ;;  %s398_s30 = scalar_lea.vmem %s315_s28, 256 }
 0x3d8   :  { %p395_p0 = scmp.ne.s32.totalorder %s315_s28, %s394_s29  ;;  %p399_p1 = scmp.lt.s32.totalorder %s315_s28, %s315_s28 }
 0x3d9   :  { %p400_p2 = scmp.lt.s32.totalorder %s398_s30, %s394_s29 }
 0x3db   :  { %p401_p3 = por %p400_p2, %p399_p1 }
 0x3dd   :  { %p402_p4 = pnand %p401_p3, %p395_p0 }
 0x3df   :  { %405 = shalt.err (!%p402_p4)
}
 0x3e0   :  { %s406_s11 = scalar_lea.hbm %s548_s9, 128 }
 0x3e1   :  { %p407_p5 = scmp.ne.s32.totalorder %s548_s9, %s406_s11  ;;  %p410_p6 = scmp.lt.u32.totalorder %s406_s11, %s548_s9 }
 0x3e3   :  { %p412_p7 = pnand %p410_p6, %p407_p5 }
 0x3e5   :  { %415 = shalt.err (!%p412_p7)
}
 0x3e6   :  { %s421_s14 = smov 128   ;;  %s422_s15 = smov 8  }
 0x3e7   :  { %320 = dma.vmem_to_hbm [thread:$0]  %s315_s28, 128, %s548_s9, [#allocation3], %s421_s14, %s421_s14, %s422_s15  }
 0x3e8   :  { %416 = dma.done.wait [#allocation3], 256  }
 0x3e9   :  { %417 = vsyncadd [#allocation3], 4294967040 }
 0x3ea   :  { %324 = vsyncpa [#allocation3], 1 }

</bundles_post_ra>
